<compile_context>
chip_gen: v5e
topology: v5e:2x2
jax: 0.10.0
libtpu: 0.0.40
codegen_flags: <defaults>
</compile_context>

<pallas_src>
import numpy as np
import jax
import jax.numpy as jnp
from jax.experimental import pallas as pl
from jax.experimental.pallas import tpu as pltpu


def mlpbase_kernel(x_ref, w1_ref, b1_ref, w2_ref, b2_ref, wcl_ref, bcl_ref,
                   out_ref):
    x = x_ref[...]

    # Fused layer 1: [actor | critic] halves computed in one (TB, 2H) matmul.
    h1 = jnp.tanh(jnp.dot(x, w1_ref[...], preferred_element_type=jnp.float32)
                  + b1_ref[...])
    # Fused layer 2: block-diagonal (2H, 2H) weight keeps the halves independent.
    h2 = jnp.tanh(jnp.dot(h1, w2_ref[...], preferred_element_type=jnp.float32)
                  + b2_ref[...])

    # critic_linear: hidden -> 1 as a VPU multiply + lane reduce. The actor half
    # of wcl is zero-padded, so this equals hidden_critic @ wcl + bcl.
    value = jnp.sum(h2 * wcl_ref[...], axis=-1, keepdims=True) + bcl_ref[0, 0]

    # Pack into one lane-dense slab: lanes [0,H) = actor hidden, lane H = value,
    # remaining lanes zero. Keeps the store path unmasked (128-lane vst) and a
    # single output DMA stream.
    H = out_ref.shape[-1] // 2
    lane = jax.lax.broadcasted_iota(jnp.int32, h2.shape, 1)
    slab = jnp.where(lane < H, h2, jnp.where(lane == H, value, 0.0))
    out_ref[...] = slab.astype(out_ref.dtype)


def _round_up(x, m):
    return ((x + m - 1) // m) * m


def _cdiv(a, b):
    return -(-a // b)


def _num_parallel_cores():
    """TensorCores a 'parallel' grid axis can shard across on one device."""
    try:
        kind = jax.devices()[0].device_kind.lower()
    except Exception:
        return 1
    if "v7" in kind or "7x" in kind:
        return 2          # v7x: 2 TCs per chip
    if "v4" in kind or "v5p" in kind:
        return 2          # megacore
    return 1              # v5e / v6e: single TC


def _choose_tiling(B, cores, tb_cap):
    """Returns (TB, num_steps, Bp). Fewest possible grid steps; on multi-core
    chips keep the step count a multiple of the core count for balance."""
    if cores == 1 and B <= tb_cap:
        # Single full-extent block: block_shape == full array dims, so the
        # (8,128) divisibility rule doesn't apply and no pad/slice is needed.
        return B, 1, B
    num_steps = max(cores, _cdiv(B, tb_cap))
    num_steps = _cdiv(num_steps, cores) * cores
    TB = _round_up(_cdiv(B, num_steps), 8)
    return TB, num_steps, TB * num_steps


def mlpbase_forward(inputs, rnn_hxs, masks, packed, *, tb_cap=4096):
    """inputs: (B, num_inputs) f32; rnn_hxs: (B, 1); masks: (B, 1) (unused, non-recurrent)."""
    B, D = inputs.shape
    W = packed["w1"].shape[1]   # = 2H (fused actor|critic width)
    H = W // 2

    cores = _num_parallel_cores()
    TB, num_steps, Bp = _choose_tiling(B, cores, tb_cap)
    x = inputs if Bp == B else jnp.pad(inputs, ((0, Bp - B), (0, 0)))

    const = lambda shape: pl.BlockSpec(shape, lambda i: (0, 0))

    slab = pl.pallas_call(
        mlpbase_kernel,
        out_shape=jax.ShapeDtypeStruct((Bp, W), jnp.float32),
        grid=(num_steps,),
        in_specs=[
            pl.BlockSpec((TB, D), lambda i: (i, 0)),          # x: tiled over batch
            const((D, W)), const((1, W)),                     # fused layer 1 (resident)
            const((W, W)), const((1, W)),                     # fused layer 2 (resident)
            const((1, W)),                                    # padded critic_linear row
            pl.BlockSpec(memory_space=pltpu.MemorySpace.SMEM),  # bcl scalar
        ],
        out_specs=pl.BlockSpec((TB, W), lambda i: (i, 0)),    # lane-dense packed output
        compiler_params=pltpu.CompilerParams(
            dimension_semantics=("parallel",)),
    )(x, packed["w1"], packed["b1"], packed["w2"], packed["b2"],
      packed["wcl"], packed["bcl"])

    if Bp != B:
        slab = slab[:B]
    actor = slab[:, :H]
    value = slab[:, H:H + 1]
    # rnn_hxs is passed through unchanged in the non-recurrent path.
    return value, actor, rnn_hxs


def make_params(key, num_inputs, hidden_size):
    """Deterministic init mirroring the module: orthogonal(gain=sqrt(2)) weights, zero biases.
    Weights stored pre-transposed as (in, out)."""
    gain = float(np.sqrt(2.0))
    ortho = jax.nn.initializers.orthogonal(scale=gain)
    k1, k2, k3, k4, k5 = jax.random.split(key, 5)

    def linear(k, fan_in, fan_out):
        # PyTorch weight is (out, in); orthogonalize there then transpose to (in, out).
        w_pt = ortho(k, (fan_out, fan_in), jnp.float32)
        return w_pt.T, jnp.zeros((1, fan_out), jnp.float32)

    wa1, ba1 = linear(k1, num_inputs, hidden_size)
    wa2, ba2 = linear(k2, hidden_size, hidden_size)
    wc1, bc1 = linear(k3, num_inputs, hidden_size)
    wc2, bc2 = linear(k4, hidden_size, hidden_size)
    wcl, bcl = linear(k5, hidden_size, 1)
    return dict(wa1=wa1, ba1=ba1, wa2=wa2, ba2=ba2,
                wc1=wc1, bc1=bc1, wc2=wc2, bc2=bc2,
                wcl=wcl, bcl=bcl)


def pack_params(p):
    """Fuse actor/critic weights for the kernel: layer 1 concatenated along N,
    layer 2 block-diagonal, critic_linear as a zero-padded (1, 2H) row."""
    H = p["wa1"].shape[1]
    dt = p["wa1"].dtype
    w1 = jnp.concatenate([p["wa1"], p["wc1"]], axis=1)        # (D, 2H)
    b1 = jnp.concatenate([p["ba1"], p["bc1"]], axis=1)        # (1, 2H)
    z = jnp.zeros((H, H), dt)
    w2 = jnp.concatenate(
        [jnp.concatenate([p["wa2"], z], axis=1),
         jnp.concatenate([z, p["wc2"]], axis=1)], axis=0)     # (2H, 2H) block-diag
    b2 = jnp.concatenate([p["ba2"], p["bc2"]], axis=1)        # (1, 2H)
    wcl = jnp.concatenate([jnp.zeros((1, H), dt),
                           p["wcl"].reshape(1, H)], axis=1)   # (1, 2H): actor half zeroed
    bcl = p["bcl"].reshape(1, 1)
    return dict(w1=w1, b1=b1, w2=w2, b2=b2, wcl=wcl, bcl=bcl)


def mlpbase_forward_ref(inputs, rnn_hxs, masks, p):
    hc = jnp.tanh(inputs @ p["wc1"] + p["bc1"])
    hc = jnp.tanh(hc @ p["wc2"] + p["bc2"])
    ha = jnp.tanh(inputs @ p["wa1"] + p["ba1"])
    ha = jnp.tanh(ha @ p["wa2"] + p["ba2"])
    return hc @ p["wcl"] + p["bcl"], ha, rnn_hxs


def _check(B, num_inputs, hidden_size, seed):
    key = jax.random.PRNGKey(seed)
    kx, kp = jax.random.split(key)
    inputs = jax.random.normal(kx, (B, num_inputs), jnp.float32)
    # non-recurrent: recurrent_hidden_state_size == 1
    rnn_hxs = jnp.zeros((B, 1), jnp.float32)
    masks = jnp.ones((B, 1), jnp.float32)

    params = make_params(kp, num_inputs, hidden_size)
    packed = pack_params(params)

    value, actor, hxs_out = mlpbase_forward(inputs, rnn_hxs, masks, packed)
    jax.block_until_ready((value, actor, hxs_out))

    v_ref, a_ref, _ = mlpbase_forward_ref(inputs, rnn_hxs, masks, params)
    assert value.shape == (B, 1) and actor.shape == (B, hidden_size)
    np.testing.assert_allclose(np.asarray(value), np.asarray(v_ref), rtol=1e-5, atol=1e-5)
    np.testing.assert_allclose(np.asarray(actor), np.asarray(a_ref), rtol=1e-5, atol=1e-5)
    np.testing.assert_allclose(np.asarray(hxs_out), np.asarray(rnn_hxs), rtol=0, atol=0)


if __name__ == "__main__":
    # Small module-natural shapes (single / minimal grid steps).
    _check(B=8, num_inputs=32, hidden_size=64, seed=0)
    # Larger batch to exercise the tiling policy (1 full-extent step on v5e/v6e,
    # 2 balanced steps on multi-core chips) and the padded path.
    _check(B=600, num_inputs=32, hidden_size=64, seed=0)

    # TODO(synk): recurrent=True path (nn.GRU with mask-segmented unroll) not
    # implemented; module defaults to recurrent=False.
    print("KERNEL_OK")
</pallas_src>

<mosaic_0001>
module attributes {stable_mosaic.version = 11 : i64} {
  func.func @mlpbase_kernel(%arg0: i32, %arg1: memref<8x32xf32, #tpu.memory_space<vmem>>, %arg2: memref<32x128xf32, #tpu.memory_space<vmem>>, %arg3: memref<1x128xf32, #tpu.memory_space<vmem>>, %arg4: memref<128x128xf32, #tpu.memory_space<vmem>>, %arg5: memref<1x128xf32, #tpu.memory_space<vmem>>, %arg6: memref<1x128xf32, #tpu.memory_space<vmem>>, %arg7: memref<1x1xf32, #tpu.memory_space<smem>>, %arg8: memref<8x128xf32, #tpu.memory_space<vmem>>) attributes {dimension_semantics = [#tpu.dimension_semantics<parallel>], iteration_bounds = array<i64: 1>, scalar_prefetch = 0 : i64, scratch_operands = 0 : i64, tpu.core_type = #tpu.core_type<tc>, window_params = [{transform_indices = @transform_0, window_bounds = array<i64: 8, 32>}, {pipeline_mode = #tpu.pipeline_mode<synchronous>, transform_indices = @transform_1, window_bounds = array<i64: 32, 128>}, {pipeline_mode = #tpu.pipeline_mode<synchronous>, transform_indices = @transform_2, window_bounds = array<i64: 1, 128>}, {pipeline_mode = #tpu.pipeline_mode<synchronous>, transform_indices = @transform_3, window_bounds = array<i64: 128, 128>}, {pipeline_mode = #tpu.pipeline_mode<synchronous>, transform_indices = @transform_4, window_bounds = array<i64: 1, 128>}, {pipeline_mode = #tpu.pipeline_mode<synchronous>, transform_indices = @transform_5, window_bounds = array<i64: 1, 128>}, {transform_indices = @transform_6, window_bounds = array<i64: 1, 1>}, {transform_indices = @transform_7, window_bounds = array<i64: 8, 128>}]} {
    %c0 = arith.constant 0 : index
    %c0_0 = arith.constant 0 : index
    %0 = vector.load %arg1[%c0, %c0_0] : memref<8x32xf32, #tpu.memory_space<vmem>>, vector<8x32xf32>
    %c0_1 = arith.constant 0 : index
    %c0_2 = arith.constant 0 : index
    %1 = vector.load %arg2[%c0_1, %c0_2] : memref<32x128xf32, #tpu.memory_space<vmem>>, vector<32x128xf32>
    %cst = arith.constant dense<0.000000e+00> : vector<8x128xf32>
    %2 = tpu.matmul %0, %1, %cst {dimension_numbers = #tpu.dot_dimension_numbers<[1], [0], [0], [1], [0, 0, 1, 1], [], []>} : vector<8x32xf32>, vector<32x128xf32>, vector<8x128xf32> -> vector<8x128xf32>
    %c0_3 = arith.constant 0 : index
    %c0_4 = arith.constant 0 : index
    %3 = vector.load %arg3[%c0_3, %c0_4] : memref<1x128xf32, #tpu.memory_space<vmem>>, vector<1x128xf32>
    %4 = vector.broadcast %3 : vector<1x128xf32> to vector<8x128xf32>
    %5 = arith.addf %2, %4 : vector<8x128xf32>
    %6 = math.tanh %5 : vector<8x128xf32>
    %c0_5 = arith.constant 0 : index
    %c0_6 = arith.constant 0 : index
    %7 = vector.load %arg4[%c0_5, %c0_6] : memref<128x128xf32, #tpu.memory_space<vmem>>, vector<128x128xf32>
    %cst_7 = arith.constant dense<0.000000e+00> : vector<8x128xf32>
    %8 = tpu.matmul %6, %7, %cst_7 {dimension_numbers = #tpu.dot_dimension_numbers<[1], [0], [0], [1], [0, 0, 1, 1], [], []>} : vector<8x128xf32>, vector<128x128xf32>, vector<8x128xf32> -> vector<8x128xf32>
    %c0_8 = arith.constant 0 : index
    %c0_9 = arith.constant 0 : index
    %9 = vector.load %arg5[%c0_8, %c0_9] : memref<1x128xf32, #tpu.memory_space<vmem>>, vector<1x128xf32>
    %10 = vector.broadcast %9 : vector<1x128xf32> to vector<8x128xf32>
    %11 = arith.addf %8, %10 : vector<8x128xf32>
    %12 = math.tanh %11 : vector<8x128xf32>
    %c0_10 = arith.constant 0 : index
    %c0_11 = arith.constant 0 : index
    %13 = vector.load %arg6[%c0_10, %c0_11] : memref<1x128xf32, #tpu.memory_space<vmem>>, vector<1x128xf32>
    %14 = vector.broadcast %13 : vector<1x128xf32> to vector<8x128xf32>
    %15 = arith.mulf %12, %14 : vector<8x128xf32>
    %cst_12 = arith.constant dense<0.000000e+00> : vector<8xf32>
    %16 = vector.multi_reduction <add>, %15, %cst_12 [1] : vector<8x128xf32> to vector<8xf32>
    %17 = vector.shape_cast %16 : vector<8xf32> to vector<8x1xf32>
    %c0_13 = arith.constant 0 : index
    %c0_14 = arith.constant 0 : index
    %18 = memref.load %arg7[%c0_13, %c0_14] : memref<1x1xf32, #tpu.memory_space<smem>>
    %19 = vector.broadcast %18 : f32 to vector<8x1xf32>
    %20 = arith.addf %17, %19 : vector<8x1xf32>
    %21 = tpu.iota {dimensions = array<i32: 1>} : vector<8x128xi32>
    %c64_i32 = arith.constant 64 : i32
    %22 = vector.broadcast %c64_i32 : i32 to vector<8x128xi32>
    %23 = arith.cmpi slt, %21, %22 : vector<8x128xi32>
    %c64_i32_15 = arith.constant 64 : i32
    %24 = vector.broadcast %c64_i32_15 : i32 to vector<8x128xi32>
    %25 = arith.cmpi eq, %21, %24 : vector<8x128xi32>
    %cst_16 = arith.constant 0.000000e+00 : f32
    %26 = vector.shape_cast %20 : vector<8x1xf32> to vector<8x1xf32>
    %27 = vector.broadcast %26 : vector<8x1xf32> to vector<8x128xf32>
    %28 = vector.broadcast %cst_16 : f32 to vector<8x128xf32>
    %29 = arith.select %25, %27, %28 : vector<8x128xi1>, vector<8x128xf32>
    %30 = arith.select %23, %12, %29 : vector<8x128xi1>, vector<8x128xf32>
    %c0_17 = arith.constant 0 : index
    %c0_18 = arith.constant 0 : index
    %31 = vector.load %arg8[%c0_17, %c0_18] : memref<8x128xf32, #tpu.memory_space<vmem>>, vector<8x128xf32>
    tpu.vector_store %arg8[%c0_17, %c0_18], %30 {strides = array<i32>} : memref<8x128xf32, #tpu.memory_space<vmem>>, vector<8x128xf32>,
    return
  }
  func.func @transform_0(%arg0: i32) -> (i32, i32) {
    %c0_i32 = arith.constant 0 : i32
    %c0_i32_0 = arith.constant 0 : i32
    return %arg0, %c0_i32 : i32, i32
  }
  func.func @transform_1(%arg0: i32) -> (i32, i32) {
    %c0_i32 = arith.constant 0 : i32
    %c0_i32_0 = arith.constant 0 : i32
    %c0_i32_1 = arith.constant 0 : i32
    return %c0_i32, %c0_i32_0 : i32, i32
  }
  func.func @transform_2(%arg0: i32) -> (i32, i32) {
    %c0_i32 = arith.constant 0 : i32
    %c0_i32_0 = arith.constant 0 : i32
    %c0_i32_1 = arith.constant 0 : i32
    return %c0_i32, %c0_i32_0 : i32, i32
  }
  func.func @transform_3(%arg0: i32) -> (i32, i32) {
    %c0_i32 = arith.constant 0 : i32
    %c0_i32_0 = arith.constant 0 : i32
    %c0_i32_1 = arith.constant 0 : i32
    return %c0_i32, %c0_i32_0 : i32, i32
  }
  func.func @transform_4(%arg0: i32) -> (i32, i32) {
    %c0_i32 = arith.constant 0 : i32
    %c0_i32_0 = arith.constant 0 : i32
    %c0_i32_1 = arith.constant 0 : i32
    return %c0_i32, %c0_i32_0 : i32, i32
  }
  func.func @transform_5(%arg0: i32) -> (i32, i32) {
    %c0_i32 = arith.constant 0 : i32
    %c0_i32_0 = arith.constant 0 : i32
    %c0_i32_1 = arith.constant 0 : i32
    return %c0_i32, %c0_i32_0 : i32, i32
  }
  func.func @transform_6(%arg0: i32) -> (i32, i32) {
    %c0_i32 = arith.constant 0 : i32
    %c0_i32_0 = arith.constant 0 : i32
    %c0_i32_1 = arith.constant 0 : i32
    return %c0_i32, %c0_i32_0 : i32, i32
  }
  func.func @transform_7(%arg0: i32) -> (i32, i32) {
    %c0_i32 = arith.constant 0 : i32
    %c0_i32_0 = arith.constant 0 : i32
    return %arg0, %c0_i32 : i32, i32
  }
}

</mosaic_0001>

<bundles_post_ra>
// kernel: tpu_custom_call.1
= control target key start
LH: loop header
LB: loop body
LE: loop exit
PB: predicated region body
PF: predicated region fallthrough
CT: control target
= control target key end

     0   :  { %13 = vsyncpa [#allocation4], 0  ;;  %s369_s0 = inlined_call_operand.hbm [shape: f32[8,32], index: 0, kind: input, shape index: {}]   ;;  %s370_s1 = inlined_call_operand.hbm [shape: f32[32,128], index: 1, kind: input, shape index: {}]   ;;  %s371_s2 = inlined_call_operand.vmem [shape: f32[1,128], index: 2, kind: input, shape index: {}]   ;;  %s372_s3 = inlined_call_operand.hbm [shape: f32[128,128], index: 3, kind: input, shape index: {}]   ;;  %s373_s4 = inlined_call_operand.vmem [shape: f32[1,128], index: 4, kind: input, shape index: {}]   ;;  %s374_s5 = inlined_call_operand.vmem [shape: f32[1,128], index: 5, kind: input, shape index: {}]   ;;  %s375_s6 = inlined_call_operand.<no memory space> [shape: f32[1,1], index: 6, kind: input, shape index: {}]   ;;  %s376_s7 = inlined_call_operand.hbm [shape: f32[8,128], index: 7, kind: output, shape index: {}]  }
   0x1   :  { %14 = vsyncpa [#allocation7], 0  ;;  %s31_s26 = sshll.u32 %s370_s1, 4  ;;  %s32_s26 = int_to_ptr.hbm [resolvable:$true] %s31_s26 }
   0x2   :  { %15 = vsyncpa [#allocation5], 0  ;;  %s299_s27 = smov [#allocation6]   ;;  %s21_s8 = sshll.u32 %s369_s0, 4  ;;  %s22_s8 = int_to_ptr.hbm [resolvable:$true] %s21_s8 }
   0x3   :  { %s33_s28 = sshll.u32 %s299_s27, 4  ;;  %s300_s9 = smov 128   ;;  %s34_s28 = int_to_ptr.vmem [resolvable:$true] %s33_s28 }
   0x4   :  { %s301_s10 = smov 8   ;;  %s302_s11 = smov [#allocation3]  }
   0x5   :  { %39 = dma.hbm_to_vmem [thread:$0]  %s32_s26, 512, %s34_s28, [#allocation7], %s300_s9, %s300_s9, %s301_s10  }
   0x6   :  { %s23_s12 = sshll.u32 %s302_s11, 4  ;;  %s46_s15 = sshll.u32 %s372_s3, 4  ;;  %s24_s12 = int_to_ptr.vmem [resolvable:$true] %s23_s12  ;;  %s47_s15 = int_to_ptr.hbm [resolvable:$true] %s46_s15 }
   0x7   :  { %26 = dma.hbm_to_vmem [thread:$0]  %s22_s8, 128, %s24_s12, [#allocation4]  }
   0x8   :  { %s303_s1 = smov [#allocation8]  }
   0x9   :  { %s48_s16 = sshll.u32 %s303_s1, 4  ;;  %s49_s16 = int_to_ptr.vmem [resolvable:$true] %s48_s16 }
   0xa   :  { %54 = dma.hbm_to_vmem [thread:$0]  %s47_s15, 2048, %s49_s16, [#allocation7], %s300_s9, %s300_s9, %s301_s10  }
   0xb   :  { %293 = dma.done.wait [#allocation4], 128  }
   0xc   :  { %294 = vsyncadd [#allocation4], 4294967168 }
   0xd   :  { %295 = dma.done.wait [#allocation7], 2560  }
   0xe   :  { %296 = vsyncadd [#allocation7], 4294964736  ;;  %v77_v0 = vld [vmem:[#allocation6 + $0x18] sm:$0xff]  ;;  %v76_v1 = vld [vmem:[#allocation6 + $0x10] sm:$0xff]  ;;  %vm82_vm0 = vcmask 261120   ;;  %v158_v31 = vlaneseq  ;;  %v156_v33 = vstv %s375_s6  ;;  %s304_s22 = smov [#allocation9]  }
   0xf   :  { %98 = vmatpush.msra.mxu0 %v77_v0  ;;  %v122_v2 = vld [vmem:[#allocation8 + $0x78] sm:$0xff]  ;;  %v75_v3 = vld [vmem:[#allocation6 + $0x8] sm:$0xff]  ;;  %v121_v4 = vld [vmem:[#allocation8 + $0x70] sm:$0xff]  ;;  %s172_s25 = sshll.u32 %s376_s7, 4  ;;  %s173_s25 = int_to_ptr.hbm [resolvable:$true] %s172_s25 }
  0x10   :  { %127 = vmatpush.msra.mxu1 %v122_v2  ;;  %v120_v5 = vld [vmem:[#allocation8 + $0x68] sm:$0xff]  ;;  %v74_v6 = vld [vmem:[#allocation6] sm:$0xff]  ;;  %v73_v7 = vld [vmem:[#allocation3] sm:$0xff]  ;;  %v159_v32 = vand.u32 127, %v158_v31 }
  0x11   :  { %99 = vmatpush.msra.mxu0 %v76_v1  ;;  %v119_v8 = vld [vmem:[#allocation8 + $0x60] sm:$0xff]  ;;  %v118_v9 = vld [vmem:[#allocation8 + $0x58] sm:$0xff]  ;;  %v117_v10 = vld [vmem:[#allocation8 + $0x50] sm:$0xff] }
  0x12   :  { %128 = vmatpush.msra.mxu1 %v121_v4  ;;  %v116_v11 = vld [vmem:[#allocation8 + $0x48] sm:$0xff]  ;;  %v115_v12 = vld [vmem:[#allocation8 + $0x40] sm:$0xff]  ;;  %v114_v13 = vld [vmem:[#allocation8 + $0x38] sm:$0xff]  ;;  %vm161_vm1 = vcmp.eq.s32.totalorder %v159_v32, 64  ;;  %vm160_vm2 = vcmp.lt.s32.totalorder %v159_v32, 64 }
  0x13   :  { %100 = vmatpush.msra.mxu0 %v75_v3  ;;  %v113_v14 = vld [vmem:[#allocation8 + $0x30] sm:$0xff]  ;;  %v112_v15 = vld [vmem:[#allocation8 + $0x28] sm:$0xff]  ;;  %v111_v16 = vld [vmem:[#allocation8 + $0x20] sm:$0xff] }
  0x14   :  { %129 = vmatpush.msra.mxu1 %v120_v5  ;;  %v110_v17 = vld [vmem:[#allocation8 + $0x18] sm:$0xff]  ;;  %v109_v18 = vld [vmem:[#allocation8 + $0x10] sm:$0xff]  ;;  %v108_v19 = vld [vmem:[#allocation8 + $0x8] sm:$0xff] }
  0x15   :  { %101 = vmatpush.msra.mxu0 %v74_v6  ;;  %v107_v20 = vld [vmem:[#allocation8] sm:$0xff]  ;;  %v190_v21 = vld [vmem:[%s371_s2] ss:$0 sm:$0xff] }
  0x16   :  { %183 = vmatmul.msk.f32.vlgmr.msra.gmra.mxu0 %vm82_vm0, %v73_v7  ;;  %130 = vmatpush.msra.mxu1 %v119_v8  ;;  %v191_v25 = vld [vmem:[%s373_s4] ss:$0 sm:$0xff]  ;;  %s170_s4 = sshll.u32 %s304_s22, 4  ;;  %s171_s4 = int_to_ptr.vmem [resolvable:$true] %s170_s4 }
  0x17   :  { %v192_v28 = vld [vmem:[%s374_s5] ss:$0 sm:$0xff] }
  0x18   :  { %131 = vmatpush.msra.mxu1 %v118_v9 }
  0x1a   :  { %132 = vmatpush.msra.mxu1 %v117_v10 }
  0x1c   :  { %133 = vmatpush.msra.mxu1 %v116_v11 }
  0x1e   :  { %134 = vmatpush.msra.mxu1 %v115_v12 }
  0x20   :  { %135 = vmatpush.msra.mxu1 %v114_v13 }
  0x22   :  { %136 = vmatpush.msra.mxu1 %v113_v14 }
  0x24   :  { %137 = vmatpush.msra.mxu1 %v112_v15 }
  0x26   :  { %138 = vmatpush.msra.mxu1 %v111_v16 }
  0x28   :  { %139 = vmatpush.msra.mxu1 %v110_v17 }
  0x2a   :  { %140 = vmatpush.msra.mxu1 %v109_v18 }
  0x2c   :  { %141 = vmatpush.msra.mxu1 %v108_v19 }
  0x2e   :  { %142 = vmatpush.msra.mxu1 %v107_v20 }
  0x93   :  { %v103_v22 = vpop.f32.mrf.mxu0 }
  0x94   :  { %v104_v23 = vadd.f32 %v190_v21, %v103_v22 }
  0x96   :  { %193 = vtanh.f32 %v104_v23 }
  0x9c   :  { %v194_v24 = vpop.eup %193 }
  0x9d   :  { %143 = vmatmul.f32.vlgmr.msra.gmra.mxu1 %v194_v24 }
 0x11a   :  { %v144_v26 = vpop.f32.mrf.mxu1 }
 0x11b   :  { %v145_v27 = vadd.f32 %v191_v25, %v144_v26 }
 0x11d   :  { %195 = vtanh.f32 %v145_v27 }
 0x123   :  { %v196_v29 = vpop.eup %195 }
 0x124   :  { %v152_v30 = vmul.f32 %v196_v29, %v192_v28 }
 0x126   :  { %153 = vadd.xlane.f32.xlu0 %v152_v30 }
 0x199   :  { %v154_v34 = vpop.xlane.xlu0 %153 }
 0x19a   :  { %v157_v35 = vadd.f32 %v156_v33, %v154_v34 }
 0x19c   :  { %v162_v36 = vsel %vm161_vm1, %v157_v35, 0.0 }
 0x19d   :  { %v163_v37 = vsel %vm160_vm2, %v196_v29, %v162_v36 }
 0x19e   :  { %164 = vst [vmem:[#allocation9] sm:$0xff] %v163_v37 }
 0x19f   :  { %175 = dma.vmem_to_hbm [thread:$0]  %s171_s4, 128, %s173_s25, [#allocation5]  }
 0x1a0   :  { %297 = dma.done.wait [#allocation5], 128  }
 0x1a1   :  { %298 = vsyncadd [#allocation5], 4294967168 }
 0x1a2   :  { %180 = vsyncpa [#allocation4], 1 }
 0x1a3   :  { %181 = vsyncpa [#allocation7], 1 }
 0x1a4   :  { %182 = vsyncpa [#allocation5], 1 }

</bundles_post_ra>
